<compile_context>
chip_gen: v7x
topology: tpu7x:2x2x1
jax: 0.10.0
libtpu: 0.0.40
codegen_flags: <defaults>
</compile_context>

<pallas_src>
import math

import jax
import jax.numpy as jnp
from jax.experimental import pallas as pl
from jax.experimental.pallas import tpu as pltpu

_TILE_C_MAX = 512    # multiple of 8 (sublanes)
_TILE_E_MAX = 2048   # multiple of 128 (lanes)


def _pe_kernel(table_ref, out_ref):
    # table_ref: (2, TILE_E) f32   row 0 = freq, row 1 = sin phase offset
    # out_ref  : (TILE_C, TILE_E)  output tile (module dtype)
    tile_c, _ = out_ref.shape
    i = pl.program_id(0)  # tile index along C

    # Tiny (TILE_C, 2) LHS: column 0 = global position, column 1 = 1.0 (picks the
    # offset row of the table).  Only 2*TILE_C elements -> negligible VPU work.
    col = jax.lax.broadcasted_iota(jnp.int32, (tile_c, 2), 1)
    row = jax.lax.broadcasted_iota(jnp.int32, (tile_c, 2), 0)
    pos = (row + i * tile_c).astype(jnp.float32)
    lhs = jnp.where(col == 0, pos, jnp.float32(1.0))

    # Outer product pos*freq + offset on the (otherwise idle) MXU.  HIGHEST precision
    # (multi-pass f32) keeps the phase exact even for large positions; K=2 is
    # negligible MXU time.  Only sin() remains on the VPU.
    theta = jax.lax.dot_general(
        lhs, table_ref[...],
        dimension_numbers=(((1,), (0,)), ((), ())),
        preferred_element_type=jnp.float32,
        precision=jax.lax.Precision.HIGHEST,
    )
    out_ref[...] = jnp.sin(theta).astype(out_ref.dtype)


def _round_up(x: int, m: int) -> int:
    return ((x + m - 1) // m) * m


def _pick_tiles(C: int, E: int) -> tuple[int, int]:
    tile_c = C if C <= _TILE_C_MAX else _TILE_C_MAX
    tile_e = E if E <= _TILE_E_MAX else _TILE_E_MAX
    # v7x megacore: when the whole output fits in one tile but the shape is
    # non-trivial, split so the grid has >=2 programs (both TensorCores busy).
    # Tiles stay sublane/lane-aligned (mult of 8 / mult of 128) unless full-dim.
    if pl.cdiv(C, tile_c) * pl.cdiv(E, tile_e) < 2 and C * E >= 2 * 8 * 128:
        if C >= 16:
            tile_c = _round_up(pl.cdiv(C, 2), 8)
        elif E >= 256:
            tile_e = _round_up(pl.cdiv(E, 2), 128)
    return tile_c, tile_e


def make_positional_encoding(n_embed_max: int, n_context_max: int, *,
                             norm: int = 10000, dtype=jnp.float32):
    """Builds the deterministic (2, E) constant table and returns a forward(x) callable."""
    assert n_embed_max % 2 == 0, "n_embed_max must be even"

    # k = [0,0,1,1,2,2,...]  (repeat_interleave(2) of arange(E/2))
    k = jnp.repeat(jnp.arange(n_embed_max // 2), 2)
    freq_f32 = (float(norm) ** (-2.0 * k / n_embed_max)).astype(jnp.float32)   # (E_max,)
    index = jnp.arange(n_embed_max)
    off_f32 = jnp.where(index % 2 == 0,
                        jnp.float32(math.pi / 2.0),
                        jnp.float32(0.0))                                       # (E_max,)
    # Row 0: per-dim frequency.  Row 1: sin->cos phase offset.  Kept in f32 so the
    # angle is always computed in f32 regardless of the module dtype.
    table_full = jnp.stack([freq_f32, off_f32], axis=0)                         # (2, E_max)

    del n_context_max  # positions are generated in-kernel; no pos buffer needed

    def forward(x: jax.Array) -> jax.Array:
        _, C, E = x.shape
        tile_c, tile_e = _pick_tiles(C, E)
        grid = (pl.cdiv(C, tile_c), pl.cdiv(E, tile_e))

        table_e = table_full[:, :E]                                             # (2, E) f32
        itemsize = jnp.dtype(dtype).itemsize

        out = pl.pallas_call(
            _pe_kernel,
            out_shape=jax.ShapeDtypeStruct((C, E), dtype),
            grid=grid,
            in_specs=[
                # Tiny (2, TILE_E) constant table; constant along the C axis -> resident.
                pl.BlockSpec((2, tile_e), lambda i, j: (0, j)),
            ],
            out_specs=pl.BlockSpec((tile_c, tile_e), lambda i, j: (i, j)),
            compiler_params=pltpu.CompilerParams(
                # No reduction axis -> both grid axes parallel (megacore on v7x).
                dimension_semantics=("parallel", "parallel"),
            ),
            cost_estimate=pl.CostEstimate(
                flops=5 * C * E,               # outer-product mul/add + misc setup
                transcendentals=C * E,         # one sin per output element
                bytes_accessed=C * E * itemsize + 2 * E * 4,
            ),
        )(table_e)
        return out

    return forward


def _reference_forward(x, n_embed_max, n_context_max, norm=10000):
    # Pure-JAX reference mirroring the PyTorch forward, for a correctness check.
    _, C, E = x.shape
    index = jnp.arange(n_embed_max)
    k = jnp.repeat(jnp.arange(n_embed_max // 2), 2)
    freq = (float(norm) ** (-2.0 * k / n_embed_max)).astype(jnp.float32)
    sin_offset = ((index % 2 == 0) * (math.pi / 2.0)).astype(jnp.float32)
    pos = jnp.arange(n_context_max, dtype=jnp.float32)[:, None]
    return jnp.sin(pos[:C] @ freq[:E][None, :] + sin_offset[:E])


if __name__ == "__main__":
    # Module config (buffer maxima) and small input shapes consistent with forward.
    N_EMBED_MAX = 32
    N_CONTEXT_MAX = 16
    B, C, E = 2, 8, 32   # x: (batch, context, embed); E <= N_EMBED_MAX, C <= N_CONTEXT_MAX

    key = jax.random.PRNGKey(0)
    x = jax.random.normal(key, (B, C, E), dtype=jnp.float32)

    pe_forward = make_positional_encoding(N_EMBED_MAX, N_CONTEXT_MAX)
    out = pe_forward(x)
    out = jax.block_until_ready(out)

    ref = _reference_forward(x, N_EMBED_MAX, N_CONTEXT_MAX)
    assert out.shape == (C, E), out.shape
    assert jnp.allclose(out, ref, atol=1e-5, rtol=1e-5), "mismatch vs reference"

    print("KERNEL_OK")
</pallas_src>

<mosaic_0001>
module attributes {stable_mosaic.version = 11 : i64} {
  func.func @_pe_kernel(%arg0: i32, %arg1: i32, %arg2: memref<2x32xf32, #tpu.memory_space<vmem>>, %arg3: memref<8x32xf32, #tpu.memory_space<vmem>>) attributes {dimension_semantics = [#tpu.dimension_semantics<parallel>, #tpu.dimension_semantics<parallel>], iteration_bounds = array<i64: 1, 1>, scalar_prefetch = 0 : i64, scratch_operands = 0 : i64, tpu.core_type = #tpu.core_type<tc>, window_params = [{transform_indices = @transform_0, window_bounds = array<i64: 2, 32>}, {transform_indices = @transform_1, window_bounds = array<i64: 8, 32>}]} {
    %0 = tpu.iota {dimensions = array<i32: 1>} : vector<8x2xi32>
    %1 = tpu.iota {dimensions = array<i32: 0>} : vector<8x2xi32>
    %c8_i32 = arith.constant 8 : i32
    %2 = arith.muli %arg0, %c8_i32 : i32
    %3 = vector.broadcast %2 : i32 to vector<8x2xi32>
    %4 = arith.addi %1, %3 : vector<8x2xi32>
    %5 = arith.sitofp %4 : vector<8x2xi32> to vector<8x2xf32>
    %c0_i32 = arith.constant 0 : i32
    %6 = vector.broadcast %c0_i32 : i32 to vector<8x2xi32>
    %7 = arith.cmpi eq, %0, %6 : vector<8x2xi32>
    %cst = arith.constant 1.000000e+00 : f32
    %8 = vector.broadcast %cst : f32 to vector<8x2xf32>
    %9 = arith.select %7, %5, %8 : vector<8x2xi1>, vector<8x2xf32>
    %c0 = arith.constant 0 : index
    %c0_0 = arith.constant 0 : index
    %10 = vector.load %arg2[%c0, %c0_0] : memref<2x32xf32, #tpu.memory_space<vmem>>, vector<2x32xf32>
    %cst_1 = arith.constant dense<0.000000e+00> : vector<8x32xf32>
    %11 = tpu.matmul %9, %10, %cst_1 {dimension_numbers = #tpu.dot_dimension_numbers<[1], [0], [0], [1], [0, 0, 1, 1], [], []>, precision = #tpu.contract_precision<fp32>} : vector<8x2xf32>, vector<2x32xf32>, vector<8x32xf32> -> vector<8x32xf32>
    %12 = math.sin %11 : vector<8x32xf32>
    %c0_2 = arith.constant 0 : index
    %c0_3 = arith.constant 0 : index
    %13 = vector.load %arg3[%c0_2, %c0_3] : memref<8x32xf32, #tpu.memory_space<vmem>>, vector<8x32xf32>
    tpu.vector_store %arg3[%c0_2, %c0_3], %12 {strides = array<i32>} : memref<8x32xf32, #tpu.memory_space<vmem>>, vector<8x32xf32>,
    return
  }
  func.func @transform_0(%arg0: i32, %arg1: i32) -> (i32, i32) {
    %c0_i32 = arith.constant 0 : i32
    %c0_i32_0 = arith.constant 0 : i32
    return %c0_i32, %arg1 : i32, i32
  }
  func.func @transform_1(%arg0: i32, %arg1: i32) -> (i32, i32) {
    %c0_i32 = arith.constant 0 : i32
    return %arg0, %arg1 : i32, i32
  }
}

</mosaic_0001>

<bundles_post_ra>
// kernel: tpu_custom_call.1
= control target key start
LH: loop header
LB: loop body
LE: loop exit
PB: predicated region body
PF: predicated region fallthrough
CT: control target
= control target key end

     0   :  { %6 = vsyncpa [#allocation3], 0  ;;  %s799_s0 = inlined_call_operand.hbm [shape: f32[2,32], index: 0, kind: input, shape index: {}]   ;;  %s800_s1 = inlined_call_operand.hbm [shape: f32[8,32], index: 1, kind: output, shape index: {}]  }
   0x1   :  { %7 = vsyncpa [#allocation4], 0  ;;  %s728_s6 = smov [#allocation2]   ;;  %s680_s10 = scalar_lea.hbm %s799_s0, 32 }
   0x2   :  { %s14_s7 = sshll.u32 %s728_s6, 4  ;;  %p681_p0 = scmp.ne.s32.totalorder %s799_s0, %s680_s10  ;;  %s15_s7 = int_to_ptr.vmem [resolvable:$true] %s14_s7 }
   0x3   :  { %p684_p1 = scmp.lt.u32.totalorder %s680_s10, %s799_s0 }
   0x5   :  { %p686_p2 = pnand %p684_p1, %p681_p0 }
   0x7   :  { %689 = shalt.err (!%p686_p2)
}
   0x8   :  { %s690_s15 = scalar_lea.vmem %s15_s7, 32  ;;  %p695_p4 = scmp.lt.s32.totalorder %s15_s7, %s15_s7 }
   0x9   :  { %p691_p3 = scmp.ne.s32.totalorder %s15_s7, %s690_s15  ;;  %p696_p5 = scmp.lt.s32.totalorder %s690_s15, %s690_s15 }
   0xb   :  { %p697_p6 = por %p696_p5, %p695_p4 }
   0xd   :  { %p698_p7 = pnand %p697_p6, %p691_p3 }
   0xf   :  { %701 = shalt.err (!%p698_p7)
}
  0x10   :  { %17 = dma.hbm_to_vmem [thread:$0]  %s799_s0, 32, %s15_s7, [#allocation3]  }
  0x11   :  { %724 = dma.done.wait [#allocation3], 32  }
  0x12   :  { %725 = vsyncadd [#allocation3], 4294967264  ;;  %v21_v0 = vlaneseq  ;;  %v729_v1 = vmov 0.0   ;;  %vm730_vm0 = vmmov 0   ;;  %vm32_vm2 = vcmask 15360   ;;  %s737_s0 = smov [#allocation5]  }
  0x13   :  { %638 = vmatprep.subr.mxu0 %v729_v1  ;;  %640 = vmatprep.mubr.msk.f32.mxu0 %vm730_vm0, %v729_v1  ;;  %vm36_vm3 = vcmask 1041408   ;;  %v31_v6 = vld [vmem:[#allocation2] sm:$0x3]  ;;  %v731_v34 = vmov 683565275   ;;  %s598_s18 = sshll.u32 %s737_s0, 4  ;;  %s599_s18 = int_to_ptr.vmem [resolvable:$true] %s598_s18 }
  0x14   :  { %v22_v2 = vand.u32 127, %v21_v0  ;;  %v24_v3 = vshrl.u32 %v21_v0, 7  ;;  %623 = vmatprep.subr.mxu1 %v729_v1  ;;  %625 = vmatprep.mubr.msk.f32.mxu1 %vm730_vm0, %v729_v1  ;;  %v38_v8 = vsel %vm36_vm3, %v31_v6, 0  ;;  %v732_v36 = vmov 2475754826   ;;  %s702_s19 = scalar_lea.vmem %s599_s18, 128  ;;  %p707_p9 = scmp.lt.s32.totalorder %s599_s18, %s599_s18 }
  0x15   :  { %v41_v10 = vand.u32 4294901760, %v38_v8  ;;  %v733_v39 = vmov 2131351028   ;;  %v734_v42 = vmov 2102212464   ;;  %p703_p8 = scmp.ne.s32.totalorder %s599_s18, %s702_s19  ;;  %p708_p10 = scmp.lt.s32.totalorder %s702_s19, %s702_s19 }
  0x16   :  { %v28_v4 = vcvt.s32.f32 %v24_v3  ;;  %vm29_vm1 = vcmp.eq.s32.totalorder %v22_v2, 0  ;;  %v735_v45 = vmov 920167782   ;;  %v736_v48 = vmov 1326507024  }
  0x17   :  { %v118_v12 = vsub.f32 %v38_v8, %v41_v10  ;;  %639 = vmatpush3.msra.mxu0 %v41_v10  ;;  %624 = vmatpush3.msra.mxu1 %v41_v10  ;;  %p709_p11 = por %p708_p10, %p707_p9 }
  0x18   :  { %v30_v5 = vsel %vm29_vm1, %v28_v4, 1.0  ;;  %628 = vmatprep.subr.mxu1 %v729_v1  ;;  %643 = vmatprep.subr.mxu0 %v729_v1 }
  0x19   :  { %v34_v7 = vsel %vm32_vm2, %v30_v5, 0  ;;  %v119_v14 = vand.u32 4294901760, %v118_v12  ;;  %p710_p12 = pnand %p709_p11, %p703_p8 }
  0x1a   :  { %v106_v9 = vand.u32 4294901760, %v34_v7 }
  0x1b   :  { %v120_v16 = vsub.f32 %v118_v12, %v119_v14 }
  0x1c   :  { %v107_v11 = vsub.f32 %v34_v7, %v106_v9 }
  0x1d   :  { %v121_v18 = vand.u32 4294901760, %v120_v16 }
  0x1e   :  { %v108_v13 = vand.u32 4294901760, %v107_v11 }
  0x20   :  { %641 = vmatmul.mubr.f32.vlgmr.msra.gmra.mrb[0].mxu0 %v108_v13  ;;  %v109_v15 = vsub.f32 %v107_v11, %v108_v13 }
  0x21   :  { %644 = vmatpush3.msra.mxu0 %v119_v14  ;;  %645 = vmatprep.mubr.msk.f32.mxu0 %vm730_vm0, %v729_v1 }
  0x22   :  { %v110_v17 = vand.u32 4294901760, %v109_v15  ;;  %648 = vmatprep.subr.mxu0 %v729_v1 }
  0x24   :  { %626 = vmatmul.mubr.f32.vlgmr.msra.gmra.mrb[0].mxu1 %v110_v17 }
  0x25   :  { %629 = vmatpush3.msra.mxu1 %v121_v18  ;;  %630 = vmatprep.mubr.msk.f32.mxu1 %vm730_vm0, %v729_v1 }
  0x26   :  { %633 = vmatprep.subr.mxu1 %v729_v1 }
  0x28   :  { %646 = vmatmul.mubr.f32.vlgmr.msra.gmra.mrb[0].mxu0 %v106_v9 }
  0x29   :  { %649 = vmatpush3.msra.mxu0 %v41_v10  ;;  %650 = vmatprep.mubr.msk.f32.mxu0 %vm730_vm0, %v729_v1 }
  0x2c   :  { %631 = vmatmul.mubr.f32.vlgmr.msra.gmra.mrb[0].mxu1 %v106_v9 }
  0x2d   :  { %634 = vmatpush3.msra.mxu1 %v118_v12  ;;  %635 = vmatprep.mubr.msk.f32.mxu1 %vm730_vm0, %v729_v1  ;;  %vm590_vm0 = vcmask 261120  }
  0x30   :  { %651 = vmatmul.mubr.f32.vlgmr.msra.gmra.mrb[0].mxu0 %v106_v9 }
  0x34   :  { %636 = vmatmul.mubr.f32.vlgmr.msra.gmra.mrb[0].mxu1 %v107_v11 }
 0x103   :  { %v482_v19 = vpop.f32.mrb[0].mxu0 }
 0x104   :  { %v652_v20 = vpop.f32.mrb[1].mxu0 }
 0x107   :  { %v262_v21 = vpop.f32.mrb[0].mxu1 }
 0x108   :  { %v766_v22 = vadd.f32 %v482_v19, %v262_v21  ;;  %v637_v23 = vpop.f32.mrb[1].mxu1 }
 0x10a   :  { %v489_v24 = vand.u32 2139095040, %v766_v22  ;;  %v486_v28 = vand.u32 2147483647, %v766_v22  ;;  %vm488_vm11 = vcmp.lt.s32.totalorder %v766_v22, 0  ;;  %vm578_vm1 = vweird.f32 %v766_v22 }
 0x10c   :  { %v490_v25 = vshrl.u32 %v489_v24, 23  ;;  %v493_v31 = vand.u32 8388607, %v486_v28  ;;  %vm487_vm12 = vcmp.le.f32.partialorder %v486_v28, 0.7853982 }
 0x10e   :  { %v607_v26 = vadd.s32 4294967169, %v490_v25  ;;  %v494_v50 = vor.u32 8388608, %v493_v31 }
 0x110   :  { %v496_v27 = vadd.s32 1, %v607_v26  ;;  %v534_v0 = vshll.u32 %v494_v50, 8 }
 0x112   :  { %vm497_vm4 = vcmp.gt.s32.totalorder %v496_v27, 0 }
 0x113   :  { %v498_v29 = vsel %vm497_vm4, %v496_v27, 0 }
 0x114   :  { %v500_v30 = vand.u32 31, %v498_v29  ;;  %v499_v33 = vshrl.u32 %v498_v29, 5 }
 0x116   :  { %v501_v32 = vsub.s32 32, %v500_v30  ;;  %v503_v35 = vshll.u32 %v731_v34, %v500_v30  ;;  %v506_v37 = vshll.u32 %v732_v36, %v500_v30  ;;  %v509_v41 = vshll.u32 %v733_v39, %v500_v30 }
 0x117   :  { %v512_v44 = vshll.u32 %v734_v42, %v500_v30  ;;  %v515_v47 = vshll.u32 %v735_v45, %v500_v30  ;;  %vm518_vm5 = vcmp.lt.s32.totalorder %v499_v33, 1  ;;  %vm521_vm6 = vcmp.lt.s32.totalorder %v499_v33, 4 }
 0x118   :  { %v504_v38 = vshrl.u32 %v732_v36, %v501_v32  ;;  %v507_v40 = vshrl.u32 %v733_v39, %v501_v32  ;;  %v510_v43 = vshrl.u32 %v734_v42, %v501_v32  ;;  %v513_v46 = vshrl.u32 %v735_v45, %v501_v32 }
 0x119   :  { %v516_v49 = vshrl.u32 %v736_v48, %v501_v32  ;;  %v502_v59 = vshrl.u32 %v731_v34, %v501_v32  ;;  %vm520_vm7 = vcmp.lt.s32.totalorder %v499_v33, 3  ;;  %vm519_vm8 = vcmp.lt.s32.totalorder %v499_v33, 2 }
 0x11a   :  { %v505_v51 = vor.u32 %v504_v38, %v503_v35  ;;  %v508_v52 = vor.u32 %v507_v40, %v506_v37  ;;  %v511_v53 = vor.u32 %v510_v43, %v509_v41  ;;  %v514_v54 = vor.u32 %v513_v46, %v512_v44 }
 0x11b   :  { %v517_v55 = vor.u32 %v516_v49, %v515_v47 }
 0x11c   :  { %v523_v56 = vsel %vm521_vm6, %v511_v53, 2102212464  ;;  %v526_v57 = vsel %vm518_vm5, %v505_v51, %v508_v52  ;;  %v530_v58 = vsel %vm518_vm5, %v508_v52, %v511_v53  ;;  %v527_v60 = vsel %vm521_vm6, %v514_v54, 920167782 }
 0x11d   :  { %v531_v61 = vsel %vm521_vm6, %v517_v55, 1326507024  ;;  %v528_v62 = vsel %vm520_vm7, %v511_v53, %v527_v60  ;;  %v522_v1 = vsel %vm518_vm5, %v502_v59, %v505_v51  ;;  %v524_v2 = vsel %vm520_vm7, %v508_v52, %v523_v56 }
 0x11e   :  { %v532_v63 = vsel %vm520_vm7, %v514_v54, %v531_v61  ;;  %v529_v3 = vsel %vm519_vm8, %v526_v57, %v528_v62  ;;  %v525_v9 = vsel %vm519_vm8, %v522_v1, %v524_v2 }
 0x11f   :  { %v533_v4 = vsel %vm519_vm8, %v530_v58, %v532_v63  ;;  %v775_v7 = vmul.u32.u64.low %v534_v0, %v529_v3  ;;  %v776_v8 = vmul.u32.u64.high %v534_v0, %v529_v3, %v775_v7  ;;  %v541_v11 = vmul.u32 %v534_v0, %v525_v9 }
 0x120   :  { %v772_v5 = vmul.u32.u64.low %v534_v0, %v533_v4  ;;  %v773_v6 = vmul.u32.u64.high %v534_v0, %v533_v4, %v772_v5 }
 0x121   :  { %v544_v10 = vadd.s32 1, %v776_v8 }
 0x122   :  { %vm543_vm9 = vc.u32 %v773_v6, %v775_v7  ;;  %v542_v24 = vadd.s32 %v775_v7, %v773_v6 }
 0x123   :  { %v545_v12 = vsel %vm543_vm9, %v544_v10, %v776_v8 }
 0x124   :  { %v546_v13 = vadd.s32 %v545_v12, %v541_v11 }
 0x126   :  { %v547_v14 = vadd.s32 536870912, %v546_v13 }
 0x128   :  { %v548_v15 = vshrl.u32 %v547_v14, 30 }
 0x12a   :  { %v549_v16 = vshll.u32 %v548_v15, 30  ;;  %v572_v37 = vsub.s32 4, %v548_v15 }
 0x12c   :  { %v550_v17 = vsub.s32 %v546_v13, %v549_v16  ;;  %v573_v40 = vsel %vm488_vm11, %v572_v37, %v548_v15 }
 0x12d   :  { %v575_v42 = vsel %vm487_vm12, 0, %v573_v40 }
 0x12e   :  { %v552_v18 = vsub.s32 0, %v550_v17  ;;  %v579_v43 = vadd.s32 3, %v575_v42 }
 0x130   :  { %v608_v19 = vmin.u32 %v552_v18, %v550_v17  ;;  %v580_v44 = vand.u32 3, %v579_v43 }
 0x132   :  { %v554_v20 = vclz %v608_v19  ;;  %vm585_vm13 = vcmp.eq.s32.totalorder %v580_v44, 2  ;;  %vm582_vm14 = vcmp.eq.s32.totalorder %v580_v44, 0  ;;  %vm581_vm15 = vcmp.lt.s32.totalorder %v580_v44, 2 }
 0x134   :  { %v609_v21 = vadd.s32 4294967294, %v554_v20 }
 0x136   :  { %vm610_vm10 = vcmp.lt.s32.totalorder %v609_v21, 0 }
 0x137   :  { %v557_v23 = vsel %vm610_vm10, 0, %v609_v21 }
 0x138   :  { %v558_v25 = vsub.s32 32, %v557_v23  ;;  %v562_v26 = vsub.s32 4294967266, %v557_v23  ;;  %v559_v27 = vshll.u32 %v550_v17, %v557_v23 }
 0x13a   :  { %v560_v29 = vshrl.u32 %v542_v24, %v558_v25  ;;  %v563_v30 = vadd.s32 127, %v562_v26 }
 0x13c   :  { %v561_v31 = vor.u32 %v560_v29, %v559_v27  ;;  %v564_v32 = vshll.u32 %v563_v30, 23 }
 0x13e   :  { %v565_v33 = vor.u32 4788187, %v564_v32  ;;  %v568_v35 = vcvt.s32.f32 %v561_v31 }
 0x140   :  { %v566_v34 = vand.u32 2147483647, %v565_v33 }
 0x142   :  { %v569_v36 = vmul.f32 %v568_v35, %v566_v34 }
 0x144   :  { %v570_v38 = vxor.u32 2147483648, %v569_v36 }
 0x146   :  { %v571_v39 = vsel %vm488_vm11, %v570_v38, %v569_v36 }
 0x147   :  { %v574_v41 = vsel %vm487_vm12, %v766_v22, %v571_v39 }
 0x148   :  { %676 = vcosq.f32 %v574_v41 }
 0x149   :  { %678 = vsinq.f32 %v574_v41 }
 0x152   :  { %v677_v45 = vpop.eup %676 }
 0x153   :  { %v679_v46 = vpop.eup %678  ;;  %v586_v47 = vxor.u32 2147483648, %v677_v45 }
 0x154   :  { %v583_v48 = vxor.u32 2147483648, %v679_v46 }
 0x155   :  { %v587_v49 = vsel %vm585_vm13, %v586_v47, %v679_v46 }
 0x156   :  { %v584_v28 = vsel %vm582_vm14, %v677_v45, %v583_v48 }
 0x157   :  { %v588_v50 = vsel %vm581_vm15, %v584_v28, %v587_v49 }
 0x158   :  { %v589_v51 = vsel %vm578_vm1, nan, %v588_v50 }
 0x159   :  { %591 = vst.msk [vmem:[#allocation5] sm:$0xff] %vm590_vm0, %v589_v51 }
 0x15a   :  { %713 = shalt.err (!%p710_p12)
}
 0x15b   :  { %s714_s22 = scalar_lea.hbm %s800_s1, 128 }
 0x15c   :  { %p715_p13 = scmp.ne.s32.totalorder %s800_s1, %s714_s22  ;;  %p718_p0 = scmp.lt.u32.totalorder %s714_s22, %s800_s1 }
 0x15e   :  { %p720_p1 = pnand %p718_p0, %p715_p13 }
 0x160   :  { %723 = shalt.err (!%p720_p1)
}
 0x161   :  { %601 = dma.vmem_to_hbm [thread:$0]  %s599_s18, 128, %s800_s1, [#allocation4]  }
 0x162   :  { %726 = dma.done.wait [#allocation4], 128  }
 0x163   :  { %727 = vsyncadd [#allocation4], 4294967168 }
 0x164   :  { %605 = vsyncpa [#allocation3], 1 }
 0x165   :  { %606 = vsyncpa [#allocation4], 1 }

</bundles_post_ra>
